<compile_context>
chip_gen: v6e
topology: v6e:2x2x1
jax: 0.10.0
libtpu: 0.0.40
codegen_flags: <defaults>
</compile_context>

<pallas_src>
import functools

import jax
import jax.numpy as jnp
from jax.experimental import pallas as pl
from jax.experimental.pallas import tpu as pltpu


def _round_up(x, m):
    return ((x + m - 1) // m) * m


def _cdiv(a, b):
    return (a + b - 1) // b


def _embeddings_kernel(eps, type_vocab, tile, tiles_per_group,
                       pos_onehot, word_resident, *refs):
    """Flexible kernel body; ref list depends on (pos_onehot, word_resident)."""
    refs = list(refs)
    if not word_resident:
        wid_smem = refs.pop(0)            # SMEM scalar-prefetch: (n_pad,) int32
    tid_ref = refs.pop(0)                 # (T, 1) int32
    if pos_onehot:
        pid_ref = refs.pop(0)             # (T, 1) int32
        ptab_ref = refs.pop(0)            # (P, H) native dtype (VMEM resident)
    else:
        pos_ref = refs.pop(0)             # (T, H) f32 (pre-cast, streamed)
    if word_resident:
        wid_ref = refs.pop(0)             # (T, 1) int32
        wtab_ref = refs.pop(0)            # (V, H) native dtype (VMEM resident)
    else:
        w_hbm = refs.pop(0)               # (V, H) word table in HBM (pl.ANY)
    ttab_ref = refs.pop(0)                # (TV, H) f32 (pre-cast, resident)
    gamma_ref = refs.pop(0)               # (1, H) f32
    beta_ref = refs.pop(0)                # (1, H) f32
    o_ref = refs.pop(0)                   # (T, H) output block
    if not word_resident:
        w_buf = refs.pop(0)               # (2, T, H) VMEM scratch (word dtype)
        w_sem = refs.pop(0)               # DMA semaphores (2,)

    # ---- word embeddings ---------------------------------------------------
    if word_resident:
        vocab = wtab_ref.shape[0]
        wid_col = wid_ref[...]                                   # (T, 1)
        w_iota = jax.lax.broadcasted_iota(jnp.int32, (tile, vocab), 1)
        w_onehot = (wid_col == w_iota).astype(wtab_ref.dtype)    # exact select
        x = jnp.dot(w_onehot, wtab_ref[...],
                    preferred_element_type=jnp.float32)          # (T, H) f32
    else:
        g = pl.program_id(0)
        j = pl.program_id(1)
        tile_idx = g * tiles_per_group + j
        slot = jax.lax.rem(j, 2)

        def start_fetch(t_idx, buf_slot):
            base = t_idx * tile
            # Statically unrolled issue loop: SMEM id loads, address math and
            # descriptor pushes interleave instead of a rolled 1-per-iter loop.
            # TODO(synk): pad_token_id rows could be deduped / memset to zero.
            for t in range(tile):
                row = wid_smem[base + t]
                pltpu.make_async_copy(w_hbm.at[row],
                                      w_buf.at[buf_slot, t],
                                      w_sem.at[buf_slot]).start()

        @pl.when(j == 0)
        def _():
            start_fetch(tile_idx, 0)          # prologue: prime this group's slot 0

        @pl.when(j + 1 < tiles_per_group)
        def _():
            start_fetch(tile_idx + 1, 1 - slot)   # prefetch next tile

        # Single combined wait: the descriptor covers the whole (T, H) slot,
        # i.e. exactly the summed size of the T row copies on w_sem[slot].
        pltpu.make_async_copy(w_buf.at[slot], w_buf.at[slot],
                              w_sem.at[slot]).wait()

        x = w_buf[slot].astype(jnp.float32)                      # (T, H) f32

    # ---- position embeddings ------------------------------------------------
    if pos_onehot:
        npos = ptab_ref.shape[0]
        pid_col = pid_ref[...]                                   # (T, 1)
        p_iota = jax.lax.broadcasted_iota(jnp.int32, (tile, npos), 1)
        p_onehot = (pid_col == p_iota).astype(ptab_ref.dtype)    # exact select
        x = x + jnp.dot(p_onehot, ptab_ref[...],
                        preferred_element_type=jnp.float32)
    else:
        x = x + pos_ref[...]                                     # streamed, f32

    # ---- token-type embeddings: tiny table, select-sum (no gather) ----------
    tid_col = tid_ref[...]                                       # (T, 1)
    for v in range(type_vocab):
        x = x + (tid_col == v).astype(jnp.float32) * ttab_ref[v:v + 1, :]

    # ---- fused LayerNorm -----------------------------------------------------
    mean = jnp.mean(x, axis=-1, keepdims=True)
    centered = x - mean
    var = jnp.mean(centered * centered, axis=-1, keepdims=True)
    scale = gamma_ref[...] * jax.lax.rsqrt(var + eps)
    o_ref[...] = (centered * scale + beta_ref[...]).astype(o_ref.dtype)


def learned_embeddings_forward(input_ids,
                               word_emb, pos_emb, type_emb,
                               gamma, beta,
                               *,
                               token_type_ids=None,
                               position_ids=None,
                               past_key_values_length=0,
                               eps=1e-12,
                               token_tile=128,
                               force_hbm_gather=False):
    B, S = input_ids.shape
    V, H = word_emb.shape
    P = pos_emb.shape[0]
    TV = type_emb.shape[0]

    n_tok = B * S
    T = min(_round_up(int(token_tile), 8), _round_up(n_tok, 8))

    # --- path selection -------------------------------------------------------
    w_itemsize = jnp.dtype(word_emb.dtype).itemsize
    word_resident = (not force_hbm_gather and V <= 2048
                     and V * H * w_itemsize <= 4 * 2 ** 20)
    pos_stream = (position_ids is None) and (T % S == 0 or S % T == 0)

    # --- grid / padding -------------------------------------------------------
    num_tiles = _cdiv(n_tok, T)
    if word_resident:
        n_groups, tiles_per_group = 1, num_tiles
        grid = (num_tiles,)
        dim_sem = ("parallel",)
    else:
        n_groups = 2 if num_tiles >= 2 else 1     # megacore-splittable groups
        tiles_per_group = _cdiv(num_tiles, n_groups)
        num_tiles = n_groups * tiles_per_group
        grid = (n_groups, tiles_per_group)
        dim_sem = ("parallel", "arbitrary")
    n_pad = num_tiles * T

    # --- flat, padded int32 ids (clipped so bad ids never drive an OOB DMA) ---
    if token_type_ids is None:
        token_type_ids = jnp.zeros((B, S), dtype=jnp.int32)

    def flat_pad(x):
        x = x.reshape(-1).astype(jnp.int32)
        return jnp.pad(x, (0, n_pad - n_tok))

    wid = jnp.clip(flat_pad(input_ids), 0, V - 1)                   # (n_pad,)
    tid_col = jnp.clip(flat_pad(token_type_ids), 0, TV - 1).reshape(n_pad, 1)

    gamma2d = gamma.reshape(1, H).astype(jnp.float32)
    beta2d = beta.reshape(1, H).astype(jnp.float32)
    ttab_f32 = type_emb.astype(jnp.float32)     # tiny; cast once, outside grid

    if pos_stream:
        pos_rows = pos_emb[past_key_values_length:past_key_values_length + S]
        if T % S == 0:
            pos_add = jnp.tile(pos_rows, (T // S, 1))               # (T, H)
        else:                                                       # S % T == 0
            pos_add = pos_rows                                      # (S, H)
        pos_add = pos_add.astype(jnp.float32)
        n_blk = pos_add.shape[0] // T
    else:
        if position_ids is None:
            position_ids = (jnp.arange(S, dtype=jnp.int32)
                            + jnp.int32(past_key_values_length))[None, :]
            position_ids = jnp.broadcast_to(position_ids, (B, S))
        pid_col = jnp.clip(flat_pad(position_ids), 0, P - 1).reshape(n_pad, 1)

    # --- index maps -----------------------------------------------------------
    if word_resident:
        tile_map = lambda i: (i, 0)
        const_map = lambda i: (0, 0)
        if pos_stream:
            pos_map = lambda i: (i % n_blk, 0)
    else:
        tpg = tiles_per_group
        tile_map = lambda g, j, wid_ref: (g * tpg + j, 0)
        const_map = lambda g, j, wid_ref: (0, 0)
        if pos_stream:
            pos_map = lambda g, j, wid_ref: ((g * tpg + j) % n_blk, 0)

    # --- specs / args ---------------------------------------------------------
    in_specs, args = [], []

    in_specs.append(pl.BlockSpec((T, 1), tile_map)); args.append(tid_col)

    if pos_stream:
        in_specs.append(pl.BlockSpec((T, H), pos_map)); args.append(pos_add)
    else:
        in_specs.append(pl.BlockSpec((T, 1), tile_map)); args.append(pid_col)
        in_specs.append(pl.BlockSpec((P, H), const_map)); args.append(pos_emb)

    if word_resident:
        in_specs.append(pl.BlockSpec((T, 1), tile_map))
        args.append(wid.reshape(n_pad, 1))
        in_specs.append(pl.BlockSpec((V, H), const_map)); args.append(word_emb)
    else:
        in_specs.append(pl.BlockSpec(memory_space=pl.ANY)); args.append(word_emb)

    in_specs.append(pl.BlockSpec((TV, H), const_map)); args.append(ttab_f32)
    in_specs.append(pl.BlockSpec((1, H), const_map)); args.append(gamma2d)
    in_specs.append(pl.BlockSpec((1, H), const_map)); args.append(beta2d)

    out_spec = pl.BlockSpec((T, H), tile_map)

    if word_resident:
        scratch = []
        num_prefetch = 0
        call_args = tuple(args)
    else:
        scratch = [pltpu.VMEM((2, T, H), word_emb.dtype),   # double-buffer gather
                   pltpu.SemaphoreType.DMA((2,))]
        num_prefetch = 1
        call_args = (wid,) + tuple(args)

    # --- explicit VMEM budget (x2 for default double-buffering) ---------------
    vmem_bytes = 2 * T * H * 4                      # output blocks
    vmem_bytes += 2 * 2 * T * 4                     # id column blocks
    vmem_bytes += 2 * TV * H * 4 + 4 * H * 4        # type table + gamma/beta
    if pos_stream:
        vmem_bytes += 2 * T * H * 4
    else:
        vmem_bytes += 2 * P * H * jnp.dtype(pos_emb.dtype).itemsize
    if word_resident:
        vmem_bytes += 2 * V * H * w_itemsize
    else:
        vmem_bytes += 2 * T * H * w_itemsize        # gather scratch
    vmem_limit = int(min(64 * 2 ** 20, max(32 * 2 ** 20, 2 * vmem_bytes)))

    kernel = functools.partial(_embeddings_kernel, float(eps), int(TV), int(T),
                               int(tiles_per_group), not pos_stream,
                               word_resident)

    out_flat = pl.pallas_call(
        kernel,
        out_shape=jax.ShapeDtypeStruct((n_pad, H), jnp.float32),
        grid_spec=pltpu.PrefetchScalarGridSpec(
            num_scalar_prefetch=num_prefetch,
            grid=grid,
            in_specs=in_specs,
            out_specs=out_spec,
            scratch_shapes=scratch),
        compiler_params=pltpu.CompilerParams(
            dimension_semantics=dim_sem,
            vmem_limit_bytes=vmem_limit),
    )(*call_args)

    out = out_flat if n_pad == n_tok else out_flat[:n_tok]
    return out.reshape(B, S, H)


def _reference_forward(input_ids, word_emb, pos_emb, type_emb, gamma, beta,
                       token_type_ids=None, position_ids=None,
                       past_key_values_length=0, eps=1e-12):
    B, S = input_ids.shape
    if position_ids is None:
        position_ids = (jnp.arange(S, dtype=jnp.int32)
                        + past_key_values_length)[None, :]
        position_ids = jnp.broadcast_to(position_ids, (B, S))
    if token_type_ids is None:
        token_type_ids = jnp.zeros((B, S), dtype=jnp.int32)
    x = (word_emb[input_ids]
         + type_emb[token_type_ids]
         + pos_emb[position_ids])
    mean = jnp.mean(x, axis=-1, keepdims=True)
    var = jnp.mean((x - mean) ** 2, axis=-1, keepdims=True)
    y = (x - mean) * jax.lax.rsqrt(var + eps)
    return y * gamma + beta


if __name__ == "__main__":
    vocab_size = 50
    hidden_size = 32
    max_position_embeddings = 16
    type_vocab_size = 2
    pad_token_id = 0
    layer_norm_eps = 1e-12

    key = jax.random.PRNGKey(0)
    k_w, k_p, k_t, k_i1, k_i2, k_pid, k_tid = jax.random.split(key, 7)

    word_emb = 0.02 * jax.random.normal(
        k_w, (vocab_size, hidden_size), dtype=jnp.float32)
    word_emb = word_emb.at[pad_token_id].set(0.0)   # nn.Embedding padding_idx row
    pos_emb = 0.02 * jax.random.normal(
        k_p, (max_position_embeddings, hidden_size), dtype=jnp.float32)
    type_emb = 0.02 * jax.random.normal(
        k_t, (type_vocab_size, hidden_size), dtype=jnp.float32)
    gamma = jnp.ones((hidden_size,), dtype=jnp.float32)
    beta = jnp.zeros((hidden_size,), dtype=jnp.float32)

    def check(out, ref, name):
        out = jax.block_until_ready(out)
        assert out.shape == ref.shape, name
        assert jnp.allclose(out, ref, atol=1e-5, rtol=1e-5), name

    # Case 1: defaults -> resident word table + streamed positions.
    ids1 = jax.random.randint(k_i1, (2, 8), 0, vocab_size, dtype=jnp.int32)
    out1 = learned_embeddings_forward(ids1, word_emb, pos_emb, type_emb,
                                      gamma, beta, eps=layer_norm_eps)
    ref1 = _reference_forward(ids1, word_emb, pos_emb, type_emb, gamma, beta,
                              eps=layer_norm_eps)
    check(out1, ref1, "case1")

    # Case 2: forced HBM gather (double-buffered row DMAs, combined wait,
    # 2 parallel tile groups) + streamed positions with past_key_values_length.
    ids2 = jax.random.randint(k_i2, (4, 8), 0, vocab_size, dtype=jnp.int32)
    out2 = learned_embeddings_forward(ids2, word_emb, pos_emb, type_emb,
                                      gamma, beta, past_key_values_length=4,
                                      eps=layer_norm_eps, token_tile=8,
                                      force_hbm_gather=True)
    ref2 = _reference_forward(ids2, word_emb, pos_emb, type_emb, gamma, beta,
                              past_key_values_length=4, eps=layer_norm_eps)
    check(out2, ref2, "case2")

    # Case 3: explicit position/token-type ids -> resident word + one-hot pos.
    pids = jax.random.randint(k_pid, (2, 8), 0, max_position_embeddings,
                              dtype=jnp.int32)
    tids = jax.random.randint(k_tid, (2, 8), 0, type_vocab_size, dtype=jnp.int32)
    out3 = learned_embeddings_forward(ids1, word_emb, pos_emb, type_emb,
                                      gamma, beta, position_ids=pids,
                                      token_type_ids=tids, eps=layer_norm_eps)
    ref3 = _reference_forward(ids1, word_emb, pos_emb, type_emb, gamma, beta,
                              position_ids=pids, token_type_ids=tids,
                              eps=layer_norm_eps)
    check(out3, ref3, "case3")

    # Case 4: explicit position ids + forced HBM gather (one-hot pos path).
    pids4 = jax.random.randint(k_pid, (4, 8), 0, max_position_embeddings,
                               dtype=jnp.int32)
    out4 = learned_embeddings_forward(ids2, word_emb, pos_emb, type_emb,
                                      gamma, beta, position_ids=pids4,
                                      eps=layer_norm_eps, token_tile=8,
                                      force_hbm_gather=True)
    ref4 = _reference_forward(ids2, word_emb, pos_emb, type_emb, gamma, beta,
                              position_ids=pids4, eps=layer_norm_eps)
    check(out4, ref4, "case4")

    print("KERNEL_OK")
</pallas_src>

<mosaic_0001>
module attributes {stable_mosaic.version = 11 : i64} {
  func.func @_embeddings_kernel(%arg0: i32, %arg1: memref<16x1xi32, #tpu.memory_space<vmem>>, %arg2: memref<16x32xf32, #tpu.memory_space<vmem>>, %arg3: memref<16x1xi32, #tpu.memory_space<vmem>>, %arg4: memref<50x32xf32, #tpu.memory_space<vmem>>, %arg5: memref<2x32xf32, #tpu.memory_space<vmem>>, %arg6: memref<1x32xf32, #tpu.memory_space<vmem>>, %arg7: memref<1x32xf32, #tpu.memory_space<vmem>>, %arg8: memref<16x32xf32, #tpu.memory_space<vmem>>) attributes {dimension_semantics = [#tpu.dimension_semantics<parallel>], iteration_bounds = array<i64: 1>, scalar_prefetch = 0 : i64, scratch_operands = 0 : i64, tpu.core_type = #tpu.core_type<tc>, window_params = [{transform_indices = @transform_0, window_bounds = array<i64: 16, 1>}, {transform_indices = @transform_1, window_bounds = array<i64: 16, 32>}, {transform_indices = @transform_2, window_bounds = array<i64: 16, 1>}, {pipeline_mode = #tpu.pipeline_mode<synchronous>, transform_indices = @transform_3, window_bounds = array<i64: 50, 32>}, {pipeline_mode = #tpu.pipeline_mode<synchronous>, transform_indices = @transform_4, window_bounds = array<i64: 2, 32>}, {pipeline_mode = #tpu.pipeline_mode<synchronous>, transform_indices = @transform_5, window_bounds = array<i64: 1, 32>}, {pipeline_mode = #tpu.pipeline_mode<synchronous>, transform_indices = @transform_6, window_bounds = array<i64: 1, 32>}, {transform_indices = @transform_7, window_bounds = array<i64: 16, 32>}]} {
    %c0 = arith.constant 0 : index
    %c0_0 = arith.constant 0 : index
    %0 = vector.load %arg3[%c0, %c0_0] : memref<16x1xi32, #tpu.memory_space<vmem>>, vector<16x1xi32>
    %1 = tpu.iota {dimensions = array<i32: 1>} : vector<16x50xi32>
    %2 = vector.broadcast %0 : vector<16x1xi32> to vector<16x50xi32>
    %3 = arith.cmpi eq, %2, %1 : vector<16x50xi32>
    %4 = arith.extui %3 : vector<16x50xi1> to vector<16x50xi32>
    %5 = arith.sitofp %4 : vector<16x50xi32> to vector<16x50xf32>
    %c0_1 = arith.constant 0 : index
    %c0_2 = arith.constant 0 : index
    %6 = vector.load %arg4[%c0_1, %c0_2] : memref<50x32xf32, #tpu.memory_space<vmem>>, vector<50x32xf32>
    %cst = arith.constant dense<0.000000e+00> : vector<16x32xf32>
    %7 = tpu.matmul %5, %6, %cst {dimension_numbers = #tpu.dot_dimension_numbers<[1], [0], [0], [1], [0, 0, 1, 1], [], []>} : vector<16x50xf32>, vector<50x32xf32>, vector<16x32xf32> -> vector<16x32xf32>
    %c0_3 = arith.constant 0 : index
    %c0_4 = arith.constant 0 : index
    %8 = vector.load %arg2[%c0_3, %c0_4] : memref<16x32xf32, #tpu.memory_space<vmem>>, vector<16x32xf32>
    %9 = arith.addf %7, %8 : vector<16x32xf32>
    %c0_5 = arith.constant 0 : index
    %c0_6 = arith.constant 0 : index
    %10 = vector.load %arg1[%c0_5, %c0_6] : memref<16x1xi32, #tpu.memory_space<vmem>>, vector<16x1xi32>
    %c0_i32 = arith.constant 0 : i32
    %11 = vector.broadcast %c0_i32 : i32 to vector<16x1xi32>
    %12 = arith.cmpi eq, %10, %11 : vector<16x1xi32>
    %13 = arith.extui %12 : vector<16x1xi1> to vector<16x1xi32>
    %14 = arith.sitofp %13 : vector<16x1xi32> to vector<16x1xf32>
    %c0_7 = arith.constant 0 : index
    %c0_8 = arith.constant 0 : index
    %15 = vector.load %arg5[%c0_7, %c0_8] : memref<2x32xf32, #tpu.memory_space<vmem>>, vector<1x32xf32>
    %16 = vector.broadcast %14 : vector<16x1xf32> to vector<16x32xf32>
    %17 = vector.broadcast %15 : vector<1x32xf32> to vector<16x32xf32>
    %18 = arith.mulf %16, %17 : vector<16x32xf32>
    %19 = arith.addf %9, %18 : vector<16x32xf32>
    %c1_i32 = arith.constant 1 : i32
    %20 = vector.broadcast %c1_i32 : i32 to vector<16x1xi32>
    %21 = arith.cmpi eq, %10, %20 : vector<16x1xi32>
    %22 = arith.extui %21 : vector<16x1xi1> to vector<16x1xi32>
    %23 = arith.sitofp %22 : vector<16x1xi32> to vector<16x1xf32>
    %c1 = arith.constant 1 : index
    %c0_9 = arith.constant 0 : index
    %24 = vector.load %arg5[%c1, %c0_9] : memref<2x32xf32, #tpu.memory_space<vmem>>, vector<1x32xf32>
    %25 = vector.broadcast %23 : vector<16x1xf32> to vector<16x32xf32>
    %26 = vector.broadcast %24 : vector<1x32xf32> to vector<16x32xf32>
    %27 = arith.mulf %25, %26 : vector<16x32xf32>
    %28 = arith.addf %19, %27 : vector<16x32xf32>
    %cst_10 = arith.constant dense<0.000000e+00> : vector<16xf32>
    %29 = vector.multi_reduction <add>, %28, %cst_10 [1] : vector<16x32xf32> to vector<16xf32>
    %30 = vector.shape_cast %29 : vector<16xf32> to vector<16x1xf32>
    %cst_11 = arith.constant 3.200000e+01 : f32
    %31 = vector.broadcast %cst_11 : f32 to vector<16x1xf32>
    %32 = arith.divf %30, %31 : vector<16x1xf32>
    %33 = vector.broadcast %32 : vector<16x1xf32> to vector<16x32xf32>
    %34 = arith.subf %28, %33 : vector<16x32xf32>
    %35 = arith.mulf %34, %34 : vector<16x32xf32>
    %cst_12 = arith.constant dense<0.000000e+00> : vector<16xf32>
    %36 = vector.multi_reduction <add>, %35, %cst_12 [1] : vector<16x32xf32> to vector<16xf32>
    %37 = vector.shape_cast %36 : vector<16xf32> to vector<16x1xf32>
    %cst_13 = arith.constant 3.200000e+01 : f32
    %38 = vector.broadcast %cst_13 : f32 to vector<16x1xf32>
    %39 = arith.divf %37, %38 : vector<16x1xf32>
    %c0_14 = arith.constant 0 : index
    %c0_15 = arith.constant 0 : index
    %40 = vector.load %arg6[%c0_14, %c0_15] : memref<1x32xf32, #tpu.memory_space<vmem>>, vector<1x32xf32>
    %cst_16 = arith.constant 9.99999996E-13 : f32
    %41 = vector.broadcast %cst_16 : f32 to vector<16x1xf32>
    %42 = arith.addf %39, %41 : vector<16x1xf32>
    %43 = math.rsqrt %42 : vector<16x1xf32>
    %44 = vector.broadcast %40 : vector<1x32xf32> to vector<16x32xf32>
    %45 = vector.broadcast %43 : vector<16x1xf32> to vector<16x32xf32>
    %46 = arith.mulf %44, %45 : vector<16x32xf32>
    %47 = arith.mulf %34, %46 : vector<16x32xf32>
    %c0_17 = arith.constant 0 : index
    %c0_18 = arith.constant 0 : index
    %48 = vector.load %arg7[%c0_17, %c0_18] : memref<1x32xf32, #tpu.memory_space<vmem>>, vector<1x32xf32>
    %49 = vector.broadcast %48 : vector<1x32xf32> to vector<16x32xf32>
    %50 = arith.addf %47, %49 : vector<16x32xf32>
    %c0_19 = arith.constant 0 : index
    %c0_20 = arith.constant 0 : index
    %51 = vector.load %arg8[%c0_19, %c0_20] : memref<16x32xf32, #tpu.memory_space<vmem>>, vector<16x32xf32>
    tpu.vector_store %arg8[%c0_19, %c0_20], %50 {strides = array<i32>} : memref<16x32xf32, #tpu.memory_space<vmem>>, vector<16x32xf32>,
    return
  }
  func.func @transform_0(%arg0: i32) -> (i32, i32) {
    %c0_i32 = arith.constant 0 : i32
    %c0_i32_0 = arith.constant 0 : i32
    return %arg0, %c0_i32 : i32, i32
  }
  func.func @transform_1(%arg0: i32) -> (i32, i32) {
    %c1_i32 = arith.constant 1 : i32
    %c0_i32 = arith.constant 0 : i32
    %0 = arith.cmpi eq, %c1_i32, %c0_i32 : i32
    %c1_i32_0 = arith.constant 1 : i32
    %1 = arith.select %0, %c1_i32_0, %c1_i32 : i32
    %2 = arith.remsi %arg0, %1 : i32
    %c0_i32_1 = arith.constant 0 : i32
    %3 = arith.cmpi ne, %2, %c0_i32_1 : i32
    %c0_i32_2 = arith.constant 0 : i32
    %4 = arith.cmpi slt, %2, %c0_i32_2 : i32
    %c0_i32_3 = arith.constant 0 : i32
    %5 = arith.cmpi slt, %1, %c0_i32_3 : i32
    %6 = arith.xori %4, %5 : i1
    %7 = arith.andi %6, %3 : i1
    %8 = arith.addi %2, %1 : i32
    %9 = arith.select %7, %8, %2 : i32
    %c0_i32_4 = arith.constant 0 : i32
    %c0_i32_5 = arith.constant 0 : i32
    return %9, %c0_i32_4 : i32, i32
  }
  func.func @transform_2(%arg0: i32) -> (i32, i32) {
    %c0_i32 = arith.constant 0 : i32
    %c0_i32_0 = arith.constant 0 : i32
    return %arg0, %c0_i32 : i32, i32
  }
  func.func @transform_3(%arg0: i32) -> (i32, i32) {
    %c0_i32 = arith.constant 0 : i32
    %c0_i32_0 = arith.constant 0 : i32
    %c0_i32_1 = arith.constant 0 : i32
    return %c0_i32, %c0_i32_0 : i32, i32
  }
  func.func @transform_4(%arg0: i32) -> (i32, i32) {
    %c0_i32 = arith.constant 0 : i32
    %c0_i32_0 = arith.constant 0 : i32
    %c0_i32_1 = arith.constant 0 : i32
    return %c0_i32, %c0_i32_0 : i32, i32
  }
  func.func @transform_5(%arg0: i32) -> (i32, i32) {
    %c0_i32 = arith.constant 0 : i32
    %c0_i32_0 = arith.constant 0 : i32
    %c0_i32_1 = arith.constant 0 : i32
    return %c0_i32, %c0_i32_0 : i32, i32
  }
  func.func @transform_6(%arg0: i32) -> (i32, i32) {
    %c0_i32 = arith.constant 0 : i32
    %c0_i32_0 = arith.constant 0 : i32
    %c0_i32_1 = arith.constant 0 : i32
    return %c0_i32, %c0_i32_0 : i32, i32
  }
  func.func @transform_7(%arg0: i32) -> (i32, i32) {
    %c0_i32 = arith.constant 0 : i32
    %c0_i32_0 = arith.constant 0 : i32
    return %arg0, %c0_i32 : i32, i32
  }
}

</mosaic_0001>

<bundles_post_ra>
// kernel: tpu_custom_call.1
= control target key start
LH: loop header
LB: loop body
LE: loop exit
PB: predicated region body
PF: predicated region fallthrough
CT: control target
= control target key end

     0   :  { %vm59_vm0 = vcmask 1041408   ;;  %v336_v2 = vmov 0   ;;  %s441_s0 = inlined_call_operand.vmem [shape: s32[16,1], index: 0, kind: input, shape index: {}]   ;;  %s442_s1 = inlined_call_operand.vmem [shape: f32[16,32], index: 1, kind: input, shape index: {}]   ;;  %s443_s2 = inlined_call_operand.vmem [shape: s32[16,1], index: 2, kind: input, shape index: {}]   ;;  %s444_s3 = inlined_call_operand.vmem [shape: f32[50,32], index: 3, kind: input, shape index: {}]   ;;  %s445_s4 = inlined_call_operand.vmem [shape: f32[2,32], index: 4, kind: input, shape index: {}]   ;;  %s446_s5 = inlined_call_operand.vmem [shape: f32[1,32], index: 5, kind: input, shape index: {}]   ;;  %s447_s6 = inlined_call_operand.vmem [shape: f32[1,32], index: 6, kind: input, shape index: {}]   ;;  %s448_s7 = inlined_call_operand.hbm [shape: f32[16,32], index: 7, kind: output, shape index: {}]  }
   0x1   :  { %v27_v0 = vld [vmem:[%s443_s2] sm:$0xff]  ;;  %v49_v1 = vld [vmem:[%s444_s3 + $0x30] sm:$0x3]  ;;  %298 = vset.pattern.permute.xlu0 %v336_v2  ;;  %v48_v3 = vld [vmem:[%s444_s3 + $0x28] sm:$0xff]  ;;  %299 = vset.pattern.permute.xlu1 %v336_v2 }
   0x2   :  { %276 = vmatprep.subr.msk.mxu0 %vm59_vm0, %v49_v1  ;;  %32 = vperm.xlu0 %298, %v27_v0   ;;  %v47_v4 = vld [vmem:[%s444_s3 + $0x20] sm:$0xff]  ;;  %v28_v5 = vld [vmem:[%s443_s2 + $0x8] sm:$0xff] }
   0x3   :  { %277 = vmatpush3.msk.msra.mxu0 %vm59_vm0, %v49_v1 }
   0x4   :  { %278 = vmatprep.subr.mxu0 %v48_v3 }
   0x5   :  { %12 = vsyncpa [#allocation3], 0  ;;  %279 = vmatpush3.msra.mxu0 %v48_v3  ;;  %v46_v6 = vld [vmem:[%s444_s3 + $0x18] sm:$0xff]  ;;  %v138_v7 = vld [vmem:[%s441_s0] sm:$0xff]  ;;  %v337_v10 = vmov 0.0   ;;  %v29_v19 = vlaneseq  ;;  %vm52_vm5 = vcmask 408576  }
   0x6   :  { %v139_v8 = vld [vmem:[%s441_s0 + $0x8] sm:$0xff]  ;;  %280 = vmatprep.subr.mxu0 %v47_v4  ;;  %vm140_vm1 = vcmp.eq.s32.totalorder %v138_v7, 0  ;;  %vm165_vm3 = vcmp.eq.s32.totalorder %v138_v7, 1  ;;  %35 = vperm.xlu0 %298, %v28_v5   ;;  %v45_v9 = vld [vmem:[%s444_s3 + $0x10] sm:$0xff]  ;;  %v43_v18 = vld [vmem:[%s444_s3] sm:$0xff]  ;;  %vm190_vm8 = vcmask 261120  }
   0x7   :  { %vm141_vm2 = vcmp.eq.s32.totalorder %v139_v8, 0  ;;  %vm166_vm4 = vcmp.eq.s32.totalorder %v139_v8, 1  ;;  %281 = vmatpush3.msra.mxu0 %v47_v4  ;;  %v259_v11 = vsel %vm140_vm1, 1.0, %v337_v10  ;;  %v262_v13 = vsel %vm165_vm3, 1.0, %v337_v10  ;;  %v44_v16 = vld [vmem:[%s444_s3 + $0x8] sm:$0xff]  ;;  %v50_v35 = vld [vmem:[%s442_s1] sm:$0xff] }
   0x8   :  { %v260_v12 = vsel %vm141_vm2, 1.0, %v337_v10  ;;  %v263_v14 = vsel %vm166_vm4, 1.0, %v337_v10  ;;  %282 = vmatprep.subr.mxu0 %v46_v6  ;;  %v30_v20 = vand.u32 127, %v29_v19  ;;  %v261_v27 = vld [vmem:[%s445_s4] ss:$0 sm:$0xff]  ;;  %v51_v29 = vld [vmem:[%s442_s1 + $0x8] sm:$0xff] }
   0x9   :  { %v300_v15 = vpack.i.bf16 %v260_v12, %v259_v11  ;;  %283 = vmatpush3.msra.mxu0 %v46_v6  ;;  %v305_v17 = vpack.i.bf16 %v263_v14, %v262_v13  ;;  %v264_v33 = vld [vmem:[%s445_s4 + $0x1] ss:$0 sm:$0xff]  ;;  %v265_v1 = vld [vmem:[%s446_s5] ss:$0 sm:$0xff]  ;;  %s338_s30 = smov [#allocation2]  }
   0xa   :  { %284 = vmatprep.subr.mxu0 %v45_v9  ;;  %v266_v4 = vld [vmem:[%s447_s6] ss:$0 sm:$0xff]  ;;  %s243_s8 = sshll.u32 %s338_s30, 4  ;;  %s244_s8 = int_to_ptr.vmem [resolvable:$true] %s243_s8 }
   0xb   :  { %301 = vperm.xlu1 %299, %v300_v15   ;;  %285 = vmatpush3.msra.mxu0 %v45_v9  ;;  %s314_s5 = scalar_lea.vmem %s244_s8, 256  ;;  %p319_p1 = scmp.lt.s32.totalorder %s244_s8, %s244_s8 }
   0xc   :  { %286 = vmatprep.subr.mxu0 %v44_v16  ;;  %p315_p0 = scmp.ne.s32.totalorder %s244_s8, %s314_s5  ;;  %p320_p2 = scmp.lt.s32.totalorder %s314_s5, %s314_s5 }
   0xd   :  { %287 = vmatpush3.msra.mxu0 %v44_v16 }
   0xe   :  { %288 = vmatprep.subr.mxu0 %v43_v18  ;;  %p321_p3 = por %p320_p2, %p319_p1 }
   0xf   :  { %306 = vperm.xlu1 %299, %v305_v17   ;;  %289 = vmatpush3.msra.mxu0 %v43_v18 }
  0x10   :  { %p322_p4 = pnand %p321_p3, %p315_p0 }
  0x7d   :  { %v33_v21 = vpop.permute.xlu0 %32 }
  0x7e   :  { %vm37_vm6 = vcmp.eq.s32.totalorder %v33_v21, %v30_v20 }
  0x7f   :  { %v254_v22 = vsel %vm37_vm6, 1.0, %v337_v10 }
  0x80   :  { %290 = vmatprep.mubr.msk.f32.mxu0 %vm52_vm5, %v254_v22 }
  0x81   :  { %v36_v23 = vpop.permute.xlu0 %35 }
  0x82   :  { %vm38_vm7 = vcmp.eq.s32.totalorder %v36_v23, %v30_v20 }
  0x83   :  { %v255_v24 = vsel %vm38_vm7, 1.0, %v337_v10 }
  0x84   :  { %291 = vmatmul.mubr.msk.f32.vlgmr.msra.gmra.mxu0 %vm52_vm5, %v255_v24 }
  0x86   :  { %v302_v25 = vpop.permute.xlu1 %301 }
  0x87   :  { %v304_v26 = vunpack.i.h.bf16 %v302_v25  ;;  %v303_v31 = vunpack.i.l.bf16 %v302_v25 }
  0x89   :  { %v162_v30 = vmul.f32 %v304_v26, %v261_v27  ;;  %v161_v39 = vmul.f32 %v303_v31, %v261_v27 }
  0x8a   :  { %v307_v28 = vpop.permute.xlu1 %306 }
  0x8b   :  { %v309_v32 = vunpack.i.h.bf16 %v307_v28  ;;  %v308_v36 = vunpack.i.l.bf16 %v307_v28 }
  0x8d   :  { %v187_v40 = vmul.f32 %v309_v32, %v264_v33  ;;  %v186_v43 = vmul.f32 %v308_v36, %v264_v33 }
 0x144   :  { %v292_v34 = vpop.f32.mrf.mxu0 }
 0x145   :  { %v135_v37 = vadd.f32 %v292_v34, %v51_v29 }
 0x146   :  { %v129_v38 = vpop.f32.mrf.mxu0 }
 0x147   :  { %v164_v41 = vadd.f32 %v162_v30, %v135_v37  ;;  %v130_v42 = vadd.f32 %v129_v38, %v50_v35 }
 0x149   :  { %v163_v44 = vadd.f32 %v161_v39, %v130_v42  ;;  %v189_v45 = vadd.f32 %v187_v40, %v164_v41 }
 0x14b   :  { %v194_v46 = vsel %vm190_vm8, %v189_v45, 0.0  ;;  %v188_v47 = vadd.f32 %v186_v43, %v163_v44 }
 0x14c   :  { %195 = vadd.xlane.f32.xlu1 %v194_v46 }
 0x14d   :  { %v191_v48 = vsel %vm190_vm8, %v188_v47, 0.0 }
 0x14e   :  { %192 = vadd.xlane.f32.xlu0 %v191_v48 }
 0x1d5   :  { %v196_v49 = vpop.xlane.xlu1 %195 }
 0x1d6   :  { %v199_v50 = vmul.f32 0.03125, %v196_v49 }
 0x1d7   :  { %v193_v51 = vpop.xlane.xlu0 %192 }
 0x1d8   :  { %v198_v52 = vmul.f32 0.03125, %v193_v51  ;;  %v201_v53 = vsub.f32 %v189_v45, %v199_v50 }
 0x1da   :  { %v200_v54 = vsub.f32 %v188_v47, %v198_v52  ;;  %v203_v57 = vmul.f32 %v201_v53, %v201_v53 }
 0x1dc   :  { %v202_v55 = vmul.f32 %v200_v54, %v200_v54  ;;  %v207_v58 = vsel %vm190_vm8, %v203_v57, 0.0 }
 0x1de   :  { %v204_v56 = vsel %vm190_vm8, %v202_v55, 0.0 }
 0x1df   :  { %205 = vadd.xlane.f32.xlu0 %v204_v56 }
 0x1e3   :  { %208 = vadd.xlane.f32.xlu0 %v207_v58 }
 0x268   :  { %v206_v59 = vpop.xlane.xlu0 %205 }
 0x269   :  { %v210_v60 = vmul.f32 0.03125, %v206_v59 }
 0x26b   :  { %v213_v61 = vadd.f32 1e-12, %v210_v60 }
 0x26c   :  { %v209_v62 = vpop.xlane.xlu0 %208 }
 0x26d   :  { %310 = vrsqrt.f32 %v213_v61  ;;  %v211_v63 = vmul.f32 0.03125, %v209_v62 }
 0x26f   :  { %v214_v0 = vadd.f32 1e-12, %v211_v63 }
 0x271   :  { %312 = vrsqrt.f32 %v214_v0 }
 0x27a   :  { %v311_v2 = vpop.eup %310 }
 0x27b   :  { %v223_v3 = vmul.f32 %v311_v2, %v265_v1 }
 0x27d   :  { %v225_v5 = vmul.f32 %v223_v3, %v200_v54 }
 0x27e   :  { %v313_v6 = vpop.eup %312 }
 0x27f   :  { %v224_v7 = vmul.f32 %v313_v6, %v265_v1  ;;  %v234_v8 = vadd.f32 %v266_v4, %v225_v5 }
 0x281   :  { %v226_v9 = vmul.f32 %v224_v7, %v201_v53  ;;  %236 = vst.msk [vmem:[#allocation2] sm:$0xff] %vm190_vm8, %v234_v8 }
 0x283   :  { %v235_v10 = vadd.f32 %v266_v4, %v226_v9 }
 0x285   :  { %237 = vst.msk [vmem:[#allocation2 + $0x8] sm:$0xff] %vm190_vm8, %v235_v10 }
 0x286   :  { %325 = shalt.err (!%p322_p4)
}
 0x287   :  { %s339_s6 = smov 128   ;;  %s340_s9 = smov 8  }
 0x288   :  { %249 = dma.vmem_to_hbm [thread:$0]  %s244_s8, 256, %s448_s7, [#allocation3], %s339_s6, %s339_s6, %s340_s9  }
 0x289   :  { %334 = dma.done.wait [#allocation3], 256  }
 0x28a   :  { %335 = vsyncadd [#allocation3], 4294967040 }
 0x28b   :  { %253 = vsyncpa [#allocation3], 1 }

</bundles_post_ra>
